<compile_context>
chip_gen: v7x
topology: tpu7x:2x2x1
jax: 0.10.0
libtpu: 0.0.40
codegen_flags: <defaults>
</compile_context>

<pallas_src>
import math

import jax
import jax.numpy as jnp
from jax.experimental import pallas as pl
from jax.experimental.pallas import tpu as pltpu


def _copy_kernel(x_ref, o_ref):
    # Identity copy of one lane-dense (TR, C) tile through VMEM.
    o_ref[...] = x_ref[...]


def _resolve_view_shape(total: int, size) -> tuple:
    """Resolve torch.view-style sizes (at most one -1) and validate."""
    # torch also accepts x.view((a, b)) / x.view([a, b]) style.
    if len(size) == 1 and isinstance(size[0], (tuple, list)):
        size = tuple(size[0])
    size = tuple(int(s) for s in size)
    neg = [i for i, s in enumerate(size) if s == -1]
    assert len(neg) <= 1, "view(): at most one -1 allowed"
    if neg:
        known = 1
        for i, s in enumerate(size):
            if i != neg[0]:
                known *= s
        assert known > 0 and total % known == 0, "view(): size incompatible with input"
        size = size[: neg[0]] + (total // known,) + size[neg[0] + 1 :]
    prod = 1
    for s in size:
        prod *= s
    assert prod == total, "view(): total number of elements must be unchanged"
    return size


def _pick_lane_width(total: int, max_c: int = 2048):
    """Largest multiple of 128 that divides `total` (lane-dense), capped."""
    best = None
    c = 128
    while c <= max_c:
        if total % c == 0:
            best = c
        c += 128
    return best


def _pick_row_tile(R: int, C: int, itemsize: int, target_bytes: int = 2 * 1024 * 1024) -> int:
    """Largest sublane-aligned (multiple of 8) row tile dividing R, ~target_bytes/block."""
    cap = max(8, (target_bytes // max(1, C * itemsize)) // 8 * 8)
    cap = min(cap, (R // 8) * 8)
    for t in range(cap, 0, -8):
        if R % t == 0:
            return t
    return R  # full-extent fallback (single block along rows)


def view_forward(x: jax.Array, *size) -> jax.Array:
    """Pallas equivalent of View(*size).forward(x)."""
    total = math.prod(x.shape) if x.ndim else 1
    out_shape = _resolve_view_shape(total, size)

    flat = x.reshape(total)  # metadata-only glue
    itemsize = jnp.dtype(x.dtype).itemsize

    C = _pick_lane_width(total)

    if C is None:
        # Awkward / tiny sizes (total not a multiple of 128): single
        # full-extent block (valid since it equals the full array dims).
        x2 = flat.reshape(1, total)
        out2 = pl.pallas_call(
            _copy_kernel,
            out_shape=jax.ShapeDtypeStruct((1, total), x.dtype),
            in_specs=[pl.BlockSpec((1, total), lambda: (0, 0))],
            out_specs=pl.BlockSpec((1, total), lambda: (0, 0)),
        )(x2)
        return out2.reshape(out_shape)

    R = total // C
    TR = _pick_row_tile(R, C, itemsize)  # divides R exactly (or equals R)

    grid = (R // TR,)
    x2 = flat.reshape(R, C)

    out2 = pl.pallas_call(
        _copy_kernel,
        out_shape=jax.ShapeDtypeStruct((R, C), x.dtype),
        grid=grid,
        in_specs=[pl.BlockSpec((TR, C), lambda i: (i, 0))],
        out_specs=pl.BlockSpec((TR, C), lambda i: (i, 0)),
        compiler_params=pltpu.CompilerParams(
            dimension_semantics=("parallel",),      # megacore sharding on v7x
            vmem_limit_bytes=32 * 1024 * 1024,       # headroom on all chips
        ),
    )(x2)

    return out2.reshape(out_shape)


if __name__ == "__main__":
    key = jax.random.PRNGKey(0)

    # Main case: x of (2, 4, 16, 16) = 2048 elements, viewed as (-1, 256) -> (8, 256).
    x = jax.random.normal(key, (2, 4, 16, 16), dtype=jnp.float32)
    out = view_forward(x, -1, 256)
    out = jax.block_until_ready(out)
    ref = x.reshape(-1, 256)
    assert out.shape == (8, 256)
    assert out.dtype == x.dtype
    assert jnp.array_equal(out, ref), "mismatch vs reference view (f32 case)"

    # Flatten case on the same tensor: view(2, -1) -> (2, 1024).
    out2 = jax.block_until_ready(view_forward(x, 2, -1))
    assert out2.shape == (2, 1024)
    assert jnp.array_equal(out2, x.reshape(2, -1)), "mismatch vs reference view (2,-1)"

    # Awkward-size fallback path (total=105, not a multiple of 128), bf16.
    y = jax.random.normal(jax.random.PRNGKey(1), (3, 5, 7), dtype=jnp.bfloat16)
    out3 = jax.block_until_ready(view_forward(y, -1))
    assert out3.shape == (105,)
    assert jnp.array_equal(out3, y.reshape(-1)), "mismatch vs reference view (fallback)"

    print("KERNEL_OK")
</pallas_src>

<mosaic_0001>
module attributes {stable_mosaic.version = 11 : i64} {
  func.func @_copy_kernel(%arg0: i32, %arg1: memref<1x2048xf32, #tpu.memory_space<vmem>>, %arg2: memref<1x2048xf32, #tpu.memory_space<vmem>>) attributes {dimension_semantics = [#tpu.dimension_semantics<parallel>], iteration_bounds = array<i64: 1>, scalar_prefetch = 0 : i64, scratch_operands = 0 : i64, tpu.core_type = #tpu.core_type<tc>, window_params = [{transform_indices = @transform_0, window_bounds = array<i64: 1, 2048>}, {transform_indices = @transform_1, window_bounds = array<i64: 1, 2048>}]} {
    %c0 = arith.constant 0 : index
    %c0_0 = arith.constant 0 : index
    %0 = vector.load %arg1[%c0, %c0_0] : memref<1x2048xf32, #tpu.memory_space<vmem>>, vector<1x2048xf32>
    %c0_1 = arith.constant 0 : index
    %c0_2 = arith.constant 0 : index
    %1 = vector.load %arg2[%c0_1, %c0_2] : memref<1x2048xf32, #tpu.memory_space<vmem>>, vector<1x2048xf32>
    tpu.vector_store %arg2[%c0_1, %c0_2], %0 {strides = array<i32>} : memref<1x2048xf32, #tpu.memory_space<vmem>>, vector<1x2048xf32>,
    return
  }
  func.func @transform_0(%arg0: i32) -> (i32, i32) {
    %c0_i32 = arith.constant 0 : i32
    %c0_i32_0 = arith.constant 0 : i32
    return %arg0, %c0_i32 : i32, i32
  }
  func.func @transform_1(%arg0: i32) -> (i32, i32) {
    %c0_i32 = arith.constant 0 : i32
    %c0_i32_0 = arith.constant 0 : i32
    return %arg0, %c0_i32 : i32, i32
  }
}

</mosaic_0001>

<bundles_post_ra>
// kernel: tpu_custom_call.1
= control target key start
LH: loop header
LB: loop body
LE: loop exit
PB: predicated region body
PF: predicated region fallthrough
CT: control target
= control target key end

     0   :  { %6 = vsyncpa [#allocation3], 0  ;;  %s126_s0 = inlined_call_operand.hbm [shape: f32[1,2048], index: 0, kind: input, shape index: {}]   ;;  %s127_s1 = inlined_call_operand.hbm [shape: f32[1,2048], index: 1, kind: output, shape index: {}]  }
   0x1   :  { %7 = vsyncpa [#allocation4], 0  ;;  %s90_s6 = smov [#allocation2]   ;;  %s42_s10 = scalar_lea.hbm %s126_s0, 256 }
   0x2   :  { %s14_s7 = sshll.u32 %s90_s6, 4  ;;  %p43_p0 = scmp.ne.s32.totalorder %s126_s0, %s42_s10  ;;  %s15_s7 = int_to_ptr.vmem [resolvable:$true] %s14_s7 }
   0x3   :  { %p46_p1 = scmp.lt.u32.totalorder %s42_s10, %s126_s0 }
   0x5   :  { %p48_p2 = pnand %p46_p1, %p43_p0 }
   0x7   :  { %51 = shalt.err (!%p48_p2)
}
   0x8   :  { %s52_s15 = scalar_lea.vmem %s15_s7, 256  ;;  %p57_p4 = scmp.lt.s32.totalorder %s15_s7, %s15_s7 }
   0x9   :  { %p53_p3 = scmp.ne.s32.totalorder %s15_s7, %s52_s15  ;;  %p58_p5 = scmp.lt.s32.totalorder %s52_s15, %s52_s15 }
   0xb   :  { %p59_p6 = por %p58_p5, %p57_p4 }
   0xd   :  { %p60_p7 = pnand %p59_p6, %p53_p3 }
   0xf   :  { %63 = shalt.err (!%p60_p7)
}
  0x10   :  { %17 = dma.hbm_to_vmem [thread:$0]  %s126_s0, 256, %s15_s7, [#allocation3]  }
  0x11   :  { %86 = dma.done.wait [#allocation3], 256  }
  0x12   :  { %87 = vsyncadd [#allocation3], 4294967040  ;;  %s91_s18 = smov [#allocation5]   ;;  %v21_v0 = vld [vmem:[#allocation2] sm:$0xff]  ;;  %v22_v1 = vld [vmem:[#allocation2 + $0x8] sm:$0xff] }
  0x13   :  { %s31_s19 = sshll.u32 %s91_s18, 4  ;;  %23 = vst [vmem:[#allocation5] sm:$0xff] %v21_v0  ;;  %24 = vst [vmem:[#allocation5 + $0x8] sm:$0xff] %v22_v1  ;;  %s32_s19 = int_to_ptr.vmem [resolvable:$true] %s31_s19 }
  0x14   :  { %s64_s20 = scalar_lea.vmem %s32_s19, 256  ;;  %p69_p9 = scmp.lt.s32.totalorder %s32_s19, %s32_s19 }
  0x15   :  { %p65_p8 = scmp.ne.s32.totalorder %s32_s19, %s64_s20  ;;  %p70_p10 = scmp.lt.s32.totalorder %s64_s20, %s64_s20 }
  0x17   :  { %p71_p11 = por %p70_p10, %p69_p9 }
  0x19   :  { %p72_p12 = pnand %p71_p11, %p65_p8 }
  0x1b   :  { %75 = shalt.err (!%p72_p12)
}
  0x1c   :  { %s76_s0 = scalar_lea.hbm %s127_s1, 256 }
  0x1d   :  { %p77_p13 = scmp.ne.s32.totalorder %s127_s1, %s76_s0  ;;  %p80_p0 = scmp.lt.u32.totalorder %s76_s0, %s127_s1 }
  0x1f   :  { %p82_p1 = pnand %p80_p0, %p77_p13 }
  0x21   :  { %85 = shalt.err (!%p82_p1)
}
  0x22   :  { %34 = dma.vmem_to_hbm [thread:$0]  %s32_s19, 256, %s127_s1, [#allocation4]  }
  0x23   :  { %88 = dma.done.wait [#allocation4], 256  }
  0x24   :  { %89 = vsyncadd [#allocation4], 4294967040 }
  0x25   :  { %38 = vsyncpa [#allocation3], 1 }
  0x26   :  { %39 = vsyncpa [#allocation4], 1 }

</bundles_post_ra>
